<compile_context>
chip_gen: v7x
topology: tpu7x:2x2x1
jax: 0.10.0
libtpu: 0.0.40
codegen_flags: <defaults>
</compile_context>

<pallas_src>
import functools

import jax
import jax.numpy as jnp
from jax.experimental import pallas as pl
from jax.experimental.pallas import tpu as pltpu

_LANE = 128


def _round_up(n, m):
    return ((n + m - 1) // m) * m


def _sublane_unit(dtype):
    # Packed dtypes need 16 (bf16) / 32 (int8, fp8) rows per native tile.
    itemsize = jnp.dtype(dtype).itemsize
    return {4: 8, 2: 16, 1: 32}.get(itemsize, 8)


def _vmem_budget(vmem_limit_bytes):
    """Per-generation scoped-VMEM limit and per-block byte budget."""
    try:
        cap = pltpu.get_tpu_info().vmem_capacity_bytes
    except Exception:  # no TPU info available -> be conservative (v7x-sized)
        cap = 64 << 20
    if vmem_limit_bytes is None:
        if cap >= (96 << 20):        # v5e / v6e: 128 MiB physical VMEM
            vmem_limit_bytes = 72 << 20
        else:                        # v7x: 64 MiB physical VMEM per TC
            vmem_limit_bytes = 48 << 20
    # in + out, each double-buffered -> 4 live block buffers; keep headroom
    # for Mosaic internal scratch.
    target_block_bytes = max(4 << 20, (vmem_limit_bytes - (8 << 20)) // 4)
    return vmem_limit_bytes, target_block_bytes


def _lane_dense_cols(total, pref_max=4096):
    """Largest multiple of 128 (<= pref_max) that divides `total`, or None."""
    top = (min(pref_max, total) // _LANE) * _LANE
    for cols in range(top, 0, -_LANE):
        if total % cols == 0:
            return cols
    return None


def _choose_tiles(B, D, itemsize, sub, target_block_bytes, max_td=4096):
    """Pick an (8k,128k)-aligned block that fits the byte budget, keeps the
    leading 'parallel' axis split for v7x, and yields >= 4 grid steps."""
    tb_full = _round_up(B, sub)
    td_full = _round_up(D, _LANE)

    td = min(td_full, max_td)
    tb = tb_full

    # Fit the per-block byte budget: shrink batch first (keep lanes wide).
    while tb * td * itemsize > target_block_bytes and tb > sub:
        tb = max(sub, _round_up(tb // 2, sub))
    while tb * td * itemsize > target_block_bytes and td > _LANE:
        td = max(_LANE, _round_up(td // 2, _LANE))

    # v7x: >= 2 programs on the leading parallel axis when B allows it, so
    # both TensorCores stream contiguous HBM.
    if pl.cdiv(B, tb) < 2:
        half = max(sub, _round_up(-(-tb_full // 2), sub))
        if pl.cdiv(B, half) >= 2:
            tb = half

    # Pipeline overlap: aim for >= 4 total grid steps so prefetch of block
    # i+1 / writeback of i-1 hide behind block i.
    while pl.cdiv(B, tb) * pl.cdiv(D, td) < 4 and td > _LANE:
        td = max(_LANE, _round_up(td // 2, _LANE))
    while pl.cdiv(B, tb) * pl.cdiv(D, td) < 4 and tb > sub:
        tb = max(sub, _round_up(tb // 2, sub))

    return tb, td


def _optnet_kernel(x_ref, o_ref, *, h_value):
    # z = argmin ||z - x||^2 s.t. I z <= h  ==>  z = min(x, h) elementwise.
    o_ref[...] = jnp.minimum(x_ref[...], jnp.asarray(h_value, dtype=o_ref.dtype))


def optnetf_forward(x, *, h_value=7.0, vmem_limit_bytes=None, donate=False):
    """Pallas forward for OptNetf: z = min(x, h) (exact QP solution for G=I).

    x            : (..., D_in) float array (any leading batch dims, or 1-D).
    h_value      : scalar rhs (7.0 in the module) or a uniform vector.
    donate       : alias the output onto the input buffer (caller donates x).
    """
    # The module fixes h = 7 * ones; the kernel folds it into a scalar.  Accept
    # a concrete vector too, but it must be uniform for the scalar fold.
    h_arr = jnp.asarray(h_value)
    if h_arr.ndim > 0:
        h_flat = jnp.ravel(h_arr)
        if not bool(jnp.all(h_flat == h_flat[0])):
            raise ValueError("non-uniform h is not supported by the scalar-fold kernel")
        h_scalar = float(h_flat[0])
    else:
        h_scalar = float(h_arr)

    orig_shape = x.shape
    x2 = x[None, :] if x.ndim == 1 else x.reshape(-1, x.shape[-1])
    B, D = x2.shape

    itemsize = jnp.dtype(x2.dtype).itemsize
    sub = _sublane_unit(x2.dtype)
    vmem_limit_bytes, target_block_bytes = _vmem_budget(vmem_limit_bytes)

    # Lane-dense repack for small or ragged feature dims (free row-major
    # reshape for an elementwise op): wide multiple-of-128 last dim ->
    # unmasked full-width vector stores.
    if (D % _LANE != 0) or (D < 512):
        cols = _lane_dense_cols(B * D)
        if cols is not None:
            x2 = x2.reshape((B * D) // cols, cols)
            B, D = x2.shape

    if D % _LANE == 0:
        tb, td = _choose_tiles(B, D, itemsize, sub, target_block_bytes)
    else:
        # Rare fallback: full-extent (== array dim) feature block, tile batch.
        td = D
        tb = max(sub, ((target_block_bytes // max(1, td * itemsize)) // sub) * sub)
        tb = min(tb, _round_up(B, sub))
        if pl.cdiv(B, tb) < 2 and tb > sub:
            tb = max(sub, _round_up(-(-B // 2), sub))

    grid = (pl.cdiv(B, tb), pl.cdiv(D, td))
    kernel = functools.partial(_optnet_kernel, h_value=h_scalar)

    out2 = pl.pallas_call(
        kernel,
        out_shape=jax.ShapeDtypeStruct((B, D), x2.dtype),
        grid=grid,
        in_specs=[pl.BlockSpec((tb, td), lambda i, j: (i, j))],
        out_specs=pl.BlockSpec((tb, td), lambda i, j: (i, j)),
        input_output_aliases=({0: 0} if donate else {}),
        compiler_params=pltpu.CompilerParams(
            dimension_semantics=("parallel", "parallel"),
            vmem_limit_bytes=vmem_limit_bytes,
        ),
    )(x2)

    return out2.reshape(orig_shape)


if __name__ == "__main__":
    key = jax.random.PRNGKey(0)

    # Small shapes consistent with the module: a batch of D_in-vectors.
    B, D_in = 8, 128
    H_VALUE = 7.0  # h = 7 * ones(D_in) in the module (uniform -> scalar fold)

    # Scale so some entries exceed 7 (constraint binds for some coordinates).
    x = 10.0 * jax.random.normal(key, (B, D_in), dtype=jnp.float32)

    z = optnetf_forward(x, h_value=H_VALUE)
    z = jax.block_until_ready(z)

    # Reference: analytic QP solution for G = I, h = 7 * ones.
    z_ref = jnp.minimum(x, H_VALUE)
    assert z.shape == (B, D_in)
    assert jnp.allclose(z, z_ref, atol=1e-6), "mismatch vs analytic QP solution"

    print("KERNEL_OK")
</pallas_src>

<mosaic_0001>
module attributes {stable_mosaic.version = 11 : i64} {
  func.func @_optnet_kernel(%arg0: i32, %arg1: i32, %arg2: memref<8x256xf32, #tpu.memory_space<vmem>>, %arg3: memref<8x256xf32, #tpu.memory_space<vmem>>) attributes {dimension_semantics = [#tpu.dimension_semantics<parallel>, #tpu.dimension_semantics<parallel>], iteration_bounds = array<i64: 1, 4>, scalar_prefetch = 0 : i64, scratch_operands = 0 : i64, tpu.core_type = #tpu.core_type<tc>, window_params = [{transform_indices = @transform_0, window_bounds = array<i64: 8, 256>}, {transform_indices = @transform_1, window_bounds = array<i64: 8, 256>}]} {
    %c0 = arith.constant 0 : index
    %c0_0 = arith.constant 0 : index
    %0 = vector.load %arg2[%c0, %c0_0] : memref<8x256xf32, #tpu.memory_space<vmem>>, vector<8x256xf32>
    %cst = arith.constant 7.000000e+00 : f32
    %1 = vector.broadcast %cst : f32 to vector<8x256xf32>
    %2 = arith.minimumf %0, %1 : vector<8x256xf32>
    %c0_1 = arith.constant 0 : index
    %c0_2 = arith.constant 0 : index
    %3 = vector.load %arg3[%c0_1, %c0_2] : memref<8x256xf32, #tpu.memory_space<vmem>>, vector<8x256xf32>
    tpu.vector_store %arg3[%c0_1, %c0_2], %2 {strides = array<i32>} : memref<8x256xf32, #tpu.memory_space<vmem>>, vector<8x256xf32>,
    return
  }
  func.func @transform_0(%arg0: i32, %arg1: i32) -> (i32, i32) {
    %c0_i32 = arith.constant 0 : i32
    return %arg0, %arg1 : i32, i32
  }
  func.func @transform_1(%arg0: i32, %arg1: i32) -> (i32, i32) {
    %c0_i32 = arith.constant 0 : i32
    return %arg0, %arg1 : i32, i32
  }
}

</mosaic_0001>

<bundles_post_ra>
// kernel: tpu_custom_call.1
= control target key start
LH: loop header
LB: loop body
LE: loop exit
PB: predicated region body
PF: predicated region fallthrough
CT: control target
= control target key end

     0   :  { %6 = vsyncpa [#allocation3], 0  ;;  %s676_s0 = inlined_call_operand.hbm [shape: f32[1,1024], index: 0, kind: input, shape index: {}]   ;;  %s677_s1 = inlined_call_operand.hbm [shape: f32[1,1024], index: 1, kind: output, shape index: {}]  }
   0x1   :  { %8 = vsyncpa [#allocation3 + $0x1], 0 }
   0x2   :  { %9 = vsyncpa [#allocation4], 0 }
   0x3   :  { %11 = vsyncpa [#allocation4 + $0x1], 0  ;;  %s506_s6 = smov 0   ;;  %s508_s7 = smov 0  }
   0x4   :  { %s510_s8 = smov 0   ;;  %s512_s9 = smov 0  }
   0x5   :  { %s514_s10 = smov 0   ;;  %s516_s11 = smov 0  }
   0x6 LB: > { %s306_s12 = sadd.s32 4294967295, %s486_s11   ;;  %s307_s13 = sadd.s32 4294967294, %s486_s11   ;;  %s486_s11 = sphi %s516_s11, %s17_s11   ;;  %s482_s10 = sphi %s514_s10, %s688_s10   ;;  %s478_s9 = sphi %s512_s9, %s687_s9   ;;  %s474_s8 = sphi %s510_s8, %s686_s8   ;;  %s470_s7 = sphi %s508_s7, %s685_s7   ;;  %s466_s6 = sphi %s506_s6, %s684_s6  }
   0x7   : > { %s26_s14 = sadd.s32 1, %s482_s10  ;;  %s38_s15 = sadd.s32 1, %s474_s8 }
   0x8   : > { %p27_p0 = scmp.ge.s32.totalorder %s26_s14, 4  ;;  %p45_p1 = scmp.ne.s32.totalorder %s474_s8, %s470_s7 }
   0x9   : > { %p46_p2 = scmp.eq.s32.totalorder %s486_s11, 0  ;;  %p51_p3 = scmp.ne.s32.totalorder %s470_s7, %s466_s6 }
   0xa   : > { %s690_s14 = smov (%p27_p0, %s26_s14), 0  ;;  %p52_p5 = scmp.eq.s32.totalorder %s306_s12, 0 }
   0xb   : > { %p47_p4 = por %p46_p2, %p45_p1  ;;  %s34_s16 = ssub.s32 %s482_s10, %s690_s14 }
   0xc   : > { %p77_p6 = scmp.eq.s32.totalorder %s306_s12, 3  ;;  %p36_p7 = scmp.eq.s32.totalorder %s34_s16, 0 }
   0xd   : > { %p549_p8 = por %p52_p5, %p51_p3  ;;  %p83_p10 = scmp.eq.s32.totalorder %s307_s13, 3 }
   0xe   : > { %p553_p9 = por %p77_p6, %p45_p1  ;;  %p309_p12 = scmp.ge.s32.totalorder %s486_s11, 4 }
   0xf   : > { %s558_s19 = scalar_select %p36_p7, %s474_s8, %s38_s15  }
  0x10   : > { %p560_p11 = por %p83_p10, %p51_p3  ;;  %99 = sbr.rel (%p309_p12) target bundleno = 55 (0x37), region = 16 }
  0x12   : > { %s680_s20 = scalar_select %p560_p11, 1, 0 }
  0x17   : > { %102 = sbr.rel (!%p47_p4) target bundleno = 55 (0x37), region = 20  ;;  %s103_s21 = sand.u32 (%p47_p4), 1, %s474_s8  }
  0x18   : > { %s310_s22 = sshll.u32 (%p47_p4), %s103_s21, 4  ;;  %s566_s23 = scalar_lea.sflag (%p47_p4), [#allocation3], %s103_s21 }
  0x19   : > { %s107_s24 = scalar_lea.vmem (%p47_p4), [#allocation2], %s310_s22 }
  0x1e   : > { %115 = vsyncadd %s566_s23, 224  ;;  %s321_s25 = sshll.u32 %s482_s10, 5  ;;  %s122_s26 = sshll.u32 %s107_s24, 4  ;;  %s575_s26 = int_to_ptr.vmem [resolvable:$true] %s122_s26 }
  0x1f   : > { %s573_s29 = scalar_lea.hbm %s676_s0, %s321_s25  ;;  %s386_s4 = scalar_lea.hbm %s676_s0, 128 }
  0x20   : > { %s384_s30 = scalar_lea.hbm %s573_s29, 32  ;;  %p387_p0 = scmp.lt.u32.totalorder %s573_s29, %s676_s0 }
  0x21   : > { %p385_p13 = scmp.ne.s32.totalorder %s573_s29, %s384_s30  ;;  %p388_p1 = scmp.lt.u32.totalorder %s386_s4, %s384_s30 }
  0x22   : > { %p390_p3 = scmp.lt.u32.totalorder %s384_s30, %s573_s29 }
  0x23   : > { %p389_p2 = por %p388_p1, %p387_p0 }
  0x25   : > { %p391_p4 = por %p390_p3, %p389_p2 }
  0x27   : > { %p392_p5 = pnand %p391_p4, %p385_p13 }
  0x29   : > { %395 = shalt.err (!%p392_p5)
}
  0x2a   : > { %s396_s13 = scalar_lea.vmem %s575_s26, 32  ;;  %s488_s15 = smov [#allocation2]  }
  0x2b   : > { %p397_p6 = scmp.ne.s32.totalorder %s575_s26, %s396_s13  ;;  %s398_s16 = sshll.u32 %s488_s15, 4  ;;  %s399_s16 = int_to_ptr.vmem [resolvable:$false] %s398_s16 }
  0x2c   : > { %s400_s21 = scalar_lea.vmem %s399_s16, 512  ;;  %p401_p7 = scmp.lt.s32.totalorder %s575_s26, %s399_s16 }
  0x2d   : > { %p402_p10 = scmp.lt.s32.totalorder %s400_s21, %s396_s13 }
  0x2f   : > { %p403_p12 = por %p402_p10, %p401_p7 }
  0x31   : > { %p404_p11 = pnand %p403_p12, %p397_p6 }
  0x33   : > { %407 = shalt.err (!%p404_p11)
}
  0x34   : > { %s489_s22 = smov 128   ;;  %s490_s24 = smov 32  }
  0x35   : > { %s491_s25 = smov 2  }
  0x36   : > { %128 = dma.hbm_to_vmem [thread:$0]  %s573_s29, 32, %s575_s26, %s566_s23, %s489_s22, %s490_s24, %s491_s25  }
  0x37 PF: > { %p313_p13 = scmp.ge.s32.totalorder %s486_s11, 1  ;;  %p130_p0 = scmp.lt.s32.totalorder %s486_s11, 5 }
  0x39   : > { %p131_p1 = pnand %p313_p13, %p130_p0 }
  0x3a   : > { %s596_s27 = sand.u32 (!%p131_p1), 1, %s470_s7  }
  0x3b   : > { %134 = sbr.rel (%p131_p1) target bundleno = 105 (0x69), region = 24  ;;  %s314_s28 = sshll.u32 (!%p131_p1), %s596_s27, 4 }
  0x3c   : > { %s137_s30 = scalar_lea.sflag (!%p131_p1), [#allocation3], %s596_s27  ;;  %s140_s2 = scalar_lea.vmem (!%p131_p1), [#allocation2], %s314_s28 }
  0x42   : > { %457 = dma.done.wait (%p549_p8), %s137_s30, 256  }
  0x43   : > { %459 = vsyncadd (%p549_p8), %s137_s30, 4294967040  ;;  %v185_v0 = vlaneseq  ;;  %v169_v2 = vld [vmem:[%s140_s2] sm:$0x3]  ;;  %v170_v3 = vld [vmem:[%s140_s2 + $0x2] sm:$0x3]  ;;  %s158_s23 = scalar_lea.vmem [#allocation5], %s314_s28 }
  0x44   : > { %v171_v4 = vld [vmem:[%s140_s2 + $0x4] sm:$0x3]  ;;  %v177_v5 = vmin.f32 %v169_v2, 7.0  ;;  %v178_v6 = vmin.f32 %v170_v3, 7.0  ;;  %v172_v8 = vld [vmem:[%s140_s2 + $0x6] sm:$0x3] }
  0x45   : > { %vm604_vm0 = vcmp.lt.s32.totalorder %v185_v0, 256  ;;  %v179_v7 = vmin.f32 %v171_v4, 7.0  ;;  %v180_v9 = vmin.f32 %v172_v8, 7.0  ;;  %v173_v10 = vld [vmem:[%s140_s2 + $0x8] sm:$0x3]  ;;  %s198_s17 = scalar_lea.sflag [#allocation4], %s596_s27 }
  0x46   : > { %v174_v11 = vld [vmem:[%s140_s2 + $0xa] sm:$0x3]  ;;  %189 = vst.msk [vmem:[%s158_s23] sm:$0x3] %vm604_vm0, %v177_v5  ;;  %190 = vst.msk [vmem:[%s158_s23 + $0x2] sm:$0x3] %vm604_vm0, %v178_v6 }
  0x47   : > { %191 = vst.msk [vmem:[%s158_s23 + $0x4] sm:$0x3] %vm604_vm0, %v179_v7  ;;  %v181_v12 = vmin.f32 %v173_v10, 7.0  ;;  %v182_v13 = vmin.f32 %v174_v11, 7.0  ;;  %v175_v14 = vld [vmem:[%s140_s2 + $0xc] sm:$0x3] }
  0x48   : > { %v176_v15 = vld [vmem:[%s140_s2 + $0xe] sm:$0x3]  ;;  %192 = vst.msk [vmem:[%s158_s23 + $0x6] sm:$0x3] %vm604_vm0, %v180_v9  ;;  %v183_v16 = vmin.f32 %v175_v14, 7.0  ;;  %204 = sbr.rel (!%p553_p9) target bundleno = 105 (0x69), region = 32 }
  0x49   : > { %v184_v17 = vmin.f32 %v176_v15, 7.0  ;;  %193 = vst.msk [vmem:[%s158_s23 + $0x8] sm:$0x3] %vm604_vm0, %v181_v12  ;;  %194 = vst.msk [vmem:[%s158_s23 + $0xa] sm:$0x3] %vm604_vm0, %v182_v13 }
  0x4a   : > { %195 = vst.msk [vmem:[%s158_s23 + $0xc] sm:$0x3] %vm604_vm0, %v183_v16 }
  0x4b   : > { %196 = vst.msk [vmem:[%s158_s23 + $0xe] sm:$0x3] %vm604_vm0, %v184_v17 }
  0x4f   : > { %212 = vsyncadd %s198_s17, 224  ;;  %s322_s26 = sshll.u32 %s478_s9, 5  ;;  %s219_s29 = sshll.u32 %s158_s23, 4  ;;  %s635_s29 = int_to_ptr.vmem [resolvable:$true] %s219_s29 }
  0x50   : > { %s633_s5 = scalar_lea.hbm %s677_s1, %s322_s26  ;;  %s408_s12 = scalar_lea.vmem %s635_s29, 32 }
  0x51   : > { %p409_p8 = scmp.ne.s32.totalorder %s635_s29, %s408_s12  ;;  %s492_s18 = smov [#allocation5]  }
  0x52   : > { %s410_s13 = sshll.u32 %s492_s18, 4  ;;  %s411_s13 = int_to_ptr.vmem [resolvable:$false] %s410_s13 }
  0x53   : > { %s412_s15 = scalar_lea.vmem %s411_s13, 512  ;;  %p413_p9 = scmp.lt.s32.totalorder %s635_s29, %s411_s13 }
  0x54   : > { %p414_p11 = scmp.lt.s32.totalorder %s412_s15, %s408_s12 }
  0x56   : > { %p415_p2 = por %p414_p11, %p413_p9 }
  0x58   : > { %p416_p3 = pnand %p415_p2, %p409_p8 }
  0x5a   : > { %419 = shalt.err (!%p416_p3)
}
  0x5b   : > { %s420_s9 = scalar_lea.hbm %s633_s5, 32  ;;  %s422_s22 = scalar_lea.hbm %s677_s1, 128 }
  0x5c   : > { %p421_p4 = scmp.ne.s32.totalorder %s633_s5, %s420_s9  ;;  %p423_p5 = scmp.lt.u32.totalorder %s633_s5, %s677_s1 }
  0x5d   : > { %p424_p6 = scmp.lt.u32.totalorder %s422_s22, %s420_s9  ;;  %p426_p10 = scmp.lt.u32.totalorder %s420_s9, %s633_s5 }
  0x5f   : > { %p425_p7 = por %p424_p6, %p423_p5 }
  0x61   : > { %p427_p12 = por %p426_p10, %p425_p7 }
  0x63   : > { %p428_p13 = pnand %p427_p12, %p421_p4 }
  0x65   : > { %431 = shalt.err (!%p428_p13)
}
  0x66   : > { %s493_s28 = smov 32   ;;  %s494_s30 = smov 128  }
  0x67   : > { %s495_s2 = smov 2  }
  0x68   : > { %225 = dma.vmem_to_hbm [thread:$0]  %s635_s29, 32, %s633_s5, %s198_s17, %s493_s28, %s494_s30, %s495_s2  }
  0x69 PF: > { %p329_p0 = scmp.ge.s32.totalorder %s486_s11, 2  ;;  %s234_s23 = sand.u32 1, %s466_s6  }
  0x6a   : > { %p683_p1 = scmp.ne.s32.totalorder %s680_s20, 0  ;;  %s235_s26 = scalar_lea.sflag [#allocation4], %s234_s23 }
  0x6c   : > { %p326_p8 = pnand %p329_p0, %p683_p1 }
  0x6e   : > { %461 = dma.done.wait (!%p326_p8), %s235_s26, 256  }
  0x6f   : > { %463 = vsyncadd (!%p326_p8), %s235_s26, 4294967040  ;;  %s17_s11 = sadd.s32 1, %s486_s11   ;;  %s684_s6 = smov %s470_s7 }
  0x70   : > { %p14_p9 = scmp.ge.s32.totalorder %s17_s11, 6   ;;  %s685_s7 = smov %s474_s8 }
  0x71   : > { %s686_s8 = smov %s558_s19  ;;  %s687_s9 = smov %s482_s10 }
  0x72   : > { %s688_s10 = smov %s690_s14  ;;  %16 = sbr.rel (!%p14_p9) target bundleno = 6 (0x6), region = 69 }
  0x79   :  { %240 = vsyncpa [#allocation3], 1 }
  0x7a   :  { %242 = vsyncpa [#allocation3 + $0x1], 1 }
  0x7b   :  { %243 = vsyncpa [#allocation4], 1 }
  0x7c   :  { %245 = vsyncpa [#allocation4 + $0x1], 1 }

</bundles_post_ra>
